<compile_context>
chip_gen: v6e
topology: v6e:2x2x1
jax: 0.10.0
libtpu: 0.0.40
codegen_flags: <defaults>
</compile_context>

<pallas_src>
import functools

import jax
import jax.numpy as jnp
import numpy as np
from jax.experimental import pallas as pl
from jax.experimental.pallas import tpu as pltpu


def _round_up(x, m):
    return (x + m - 1) // m * m


def _num_parallel_cores():
    """Best-effort: 2 TensorCores per chip on v7x-like devices, else 1."""
    try:
        kind = jax.devices()[0].device_kind.lower()
        if "v7" in kind:
            return 2
    except Exception:  # pragma: no cover - defensive
        pass
    return 1


# ----------------------------------------------------------------------------- kernel
def decoder_kernel(x_ref, hc_ref, w_ref, b_ref, w1_ref, b1_ref, w2_ref, b2_ref,
                   y_ref, hcn_ref, *, E, Dx, F):
    BB = x_ref.shape[0]
    S = hc_ref.shape[1]

    # one wide lane-dense load of the packed state; per-layer views are lane slices
    hc = hc_ref[...]                                  # (BB, S)

    def h0(layer):
        return hc[:, layer * E:(layer + 1) * E]

    def c0(layer):
        return hc[:, (3 + layer) * E:(4 + layer) * E]

    def cell(inp_cat, c_prev, layer):
        # one fused MXU matmul per layer: [inp | h] @ [Wih; Whh]^T + (b_ih + b_hh)
        gates = (jnp.dot(inp_cat, w_ref[layer], preferred_element_type=jnp.float32)
                 + b_ref[layer])
        # full-width activations on the packed 4E-wide gates, then slice i/f/g/o
        sig = jax.nn.sigmoid(gates)
        th = jnp.tanh(gates)
        i_g = sig[:, 0 * E:1 * E]
        f_g = sig[:, 1 * E:2 * E]
        g_g = th[:, 2 * E:3 * E]
        o_g = sig[:, 3 * E:4 * E]
        c_new = f_g * c_prev + i_g * g_g
        h_new = o_g * jnp.tanh(c_new)
        return h_new, c_new

    def cat_input(part, part_width, h_prev):
        pieces = [part]
        if Dx > part_width:  # static; zero-pad input part up to Dx (exact math)
            pieces.append(jnp.zeros((BB, Dx - part_width), jnp.float32))
        pieces.append(h_prev)
        return jnp.concatenate(pieces, axis=-1)

    # layer-0 concat done in-kernel (no host-side staging buffer)
    h_l0, c_l0 = cell(cat_input(x_ref[...], F, h0(0)), c0(0), 0)
    h_l1, c_l1 = cell(cat_input(h_l0, E, h0(1)), c0(1), 1)
    h_l2, c_l2 = cell(cat_input(h_l1, E, h0(2)), c0(2), 2)

    # single wide lane-dense store of the packed new state
    parts = [h_l0, h_l1, h_l2, c_l0, c_l1, c_l2]
    if S > 6 * E:
        parts.append(jnp.zeros((BB, S - 6 * E), jnp.float32))
    hcn_ref[...] = jnp.concatenate(parts, axis=-1)

    # head: Linear(E,100)->ReLU->Linear(100,F), padded to 128 lanes (zero pads: exact)
    z = jnp.dot(h_l2, w1_ref[...], preferred_element_type=jnp.float32) + b1_ref[...]
    z = jnp.maximum(z, 0.0)
    y_ref[...] = jnp.dot(z, w2_ref[...], preferred_element_type=jnp.float32) + b2_ref[...]


# ----------------------------------------------------------------------- params / pack
def init_params(key, n_features, embedding_dim):
    """Raw parameters with the exact torch shapes."""
    E, F = embedding_dim, n_features
    ks = jax.random.split(key, 16)
    s = 0.1
    rnd = lambda k, shape: s * jax.random.normal(k, shape, dtype=jnp.float32)

    lstm = []
    in_dims = [F, E, E]
    for layer in range(3):
        k0, k1, k2, k3 = ks[4 * layer:4 * layer + 4]
        lstm.append((rnd(k0, (4 * E, in_dims[layer])),   # weight_ih_l{k}
                     rnd(k1, (4 * E, E)),                # weight_hh_l{k}
                     rnd(k2, (4 * E,)),                  # bias_ih_l{k}
                     rnd(k3, (4 * E,))))                 # bias_hh_l{k}
    k12, k13, k14, k15 = ks[12:16]
    head = (rnd(k12, (100, E)), rnd(k13, (100,)),        # output_layer1
            rnd(k14, (F, 100)), rnd(k15, (F,)))          # output_layer2
    return {"lstm": lstm, "head": head}


def pack_params(raw, n_features, embedding_dim):
    """Fuse/transpose/pad parameters for the kernel (all zero padding => exact math)."""
    E, F = embedding_dim, n_features
    G = 4 * E
    Dx = max(E, F)                     # input-part width of the fused weight
    Dcat = Dx + E
    in_dims = [F, E, E]

    w_stack, b_stack = [], []
    for layer in range(3):
        w_ih, w_hh, b_ih, b_hh = raw["lstm"][layer]
        w = jnp.zeros((Dcat, G), jnp.float32)
        w = w.at[:in_dims[layer], :].set(w_ih.T)
        w = w.at[Dx:Dx + E, :].set(w_hh.T)
        w_stack.append(w)
        b_stack.append((b_ih + b_hh).reshape(1, G))
    w_lstm = jnp.stack(w_stack)        # (3, Dcat, 4E)
    b_lstm = jnp.stack(b_stack)        # (3, 1, 4E)

    HPAD = 128                         # lane-dense hidden head width (>= 100)
    FPAD = _round_up(max(F, 128), 128)  # lane-dense output width
    w1, b1, w2, b2 = raw["head"]
    w1p = jnp.zeros((E, HPAD), jnp.float32).at[:, :100].set(w1.T)
    b1p = jnp.zeros((1, HPAD), jnp.float32).at[:, :100].set(b1)
    w2p = jnp.zeros((HPAD, FPAD), jnp.float32).at[:100, :F].set(w2.T)
    b2p = jnp.zeros((1, FPAD), jnp.float32).at[:, :F].set(b2)
    return {"w_lstm": w_lstm, "b_lstm": b_lstm,
            "w1": w1p, "b1": b1p, "w2": w2p, "b2": b2p}


# -------------------------------------------------------------------------- forward
@functools.partial(jax.jit, static_argnames=("ncores",))
def decoder_forward(x, h_0, c_0, packed, ncores=1):
    B, T, F = x.shape
    assert T == 1, "torch reshape((size,1,E)) implies seq_len == 1"
    E = h_0.shape[-1]
    G = 4 * E
    w_lstm = packed["w_lstm"]
    Dcat = w_lstm.shape[1]
    Dx = Dcat - E
    HPAD = packed["w1"].shape[1]
    FPAD = packed["w2"].shape[1]
    S = _round_up(6 * E, 128)          # lane-dense packed-state width

    # Batch blocking: whole batch in one block when it fits (amortizes per-step
    # overhead).  On v7x-like devices split into >= 2 parallel steps for 2 TCs.
    if ncores >= 2 and B >= 16:
        BB = min(1024, _round_up(pl.cdiv(B, ncores), 8))
    else:
        BB = min(1024, _round_up(B, 8))
    B_pad = _round_up(B, BB)
    grid = (B_pad // BB,)

    # x: (B_pad, F), zero-padded batch rows (sliced off after the kernel)
    x2d = x.reshape(B, F).astype(jnp.float32)
    x2d = jnp.pad(x2d, ((0, B_pad - B), (0, 0)))

    # packed recurrent state slab: lanes [0:3E) = h0 (layers 0..2), [3E:6E) = c0
    hc_cols = jnp.concatenate(
        [jnp.transpose(h_0, (1, 0, 2)).reshape(B, 3 * E),
         jnp.transpose(c_0, (1, 0, 2)).reshape(B, 3 * E)],
        axis=-1).astype(jnp.float32)
    hc0 = jnp.pad(hc_cols, ((0, B_pad - B), (0, S - 6 * E)))

    def batched_spec(shape):
        # deeper pipelining on batch-varying operands only when the grid is deep
        if grid[0] > 2 and hasattr(pl, "Buffered"):
            try:
                return pl.BlockSpec(shape, lambda b: (b, 0),
                                    pipeline_mode=pl.Buffered(3))
            except TypeError:
                pass
        return pl.BlockSpec(shape, lambda b: (b, 0))

    kernel = functools.partial(decoder_kernel, E=E, Dx=Dx, F=F)

    y_pad, hcn = pl.pallas_call(
        kernel,
        out_shape=(
            jax.ShapeDtypeStruct((B_pad, FPAD), jnp.float32),
            jax.ShapeDtypeStruct((B_pad, S), jnp.float32),
        ),
        grid=grid,
        in_specs=[
            batched_spec((BB, F)),                                # x
            batched_spec((BB, S)),                                # hc0 (aliased)
            pl.BlockSpec((3, Dcat, G), lambda b: (0, 0, 0)),      # fused LSTM weights
            pl.BlockSpec((3, 1, G), lambda b: (0, 0, 0)),         # fused LSTM biases
            pl.BlockSpec((E, HPAD), lambda b: (0, 0)),            # head W1 (padded)
            pl.BlockSpec((1, HPAD), lambda b: (0, 0)),            # head b1 (padded)
            pl.BlockSpec((HPAD, FPAD), lambda b: (0, 0)),         # head W2 (padded)
            pl.BlockSpec((1, FPAD), lambda b: (0, 0)),            # head b2 (padded)
        ],
        out_specs=(
            pl.BlockSpec((BB, FPAD), lambda b: (b, 0)),           # y (lane-dense)
            pl.BlockSpec((BB, S), lambda b: (b, 0)),              # new state slab
        ),
        input_output_aliases={1: 1},                              # hc0 -> hcn in place
        compiler_params=pltpu.CompilerParams(
            dimension_semantics=("parallel",)),
    )(x2d, hc0, w_lstm, packed["b_lstm"],
      packed["w1"], packed["b1"], packed["w2"], packed["b2"])

    y = y_pad[:B, :F].reshape(B, 1, F)
    hcn_b = hcn[:B]
    hidden_n = hcn_b[:, 0:3 * E].reshape(B, 3, E).transpose(1, 0, 2)
    cell_n = hcn_b[:, 3 * E:6 * E].reshape(B, 3, E).transpose(1, 0, 2)
    return y, hidden_n, cell_n


# ---------------------------------------------------------------------- pure-JAX ref
def reference_forward(x, h_0, c_0, raw):
    B, T, F = x.shape
    E = h_0.shape[-1]
    inp = x[:, 0, :]
    hs, cs = [], []
    for layer in range(3):
        w_ih, w_hh, b_ih, b_hh = raw["lstm"][layer]
        gates = inp @ w_ih.T + h_0[layer] @ w_hh.T + b_ih + b_hh
        i = jax.nn.sigmoid(gates[:, 0 * E:1 * E])
        f = jax.nn.sigmoid(gates[:, 1 * E:2 * E])
        g = jnp.tanh(gates[:, 2 * E:3 * E])
        o = jax.nn.sigmoid(gates[:, 3 * E:4 * E])
        c = f * c_0[layer] + i * g
        h = o * jnp.tanh(c)
        hs.append(h)
        cs.append(c)
        inp = h
    w1, b1, w2, b2 = raw["head"]
    z = jnp.maximum(inp @ w1.T + b1, 0.0)
    y = z @ w2.T + b2
    return y.reshape(B, 1, F), jnp.stack(hs), jnp.stack(cs)


# --------------------------------------------------------------------------------- main
if __name__ == "__main__":
    B, F, E = 8, 8, 32
    key = jax.random.PRNGKey(0)
    kx, kh, kc, kp = jax.random.split(key, 4)

    x = jax.random.normal(kx, (B, 1, F), dtype=jnp.float32)
    h_0 = jax.random.normal(kh, (3, B, E), dtype=jnp.float32)
    c_0 = jax.random.normal(kc, (3, B, E), dtype=jnp.float32)

    raw = init_params(kp, F, E)
    packed = pack_params(raw, F, E)

    ncores = _num_parallel_cores()
    y, hidden_n, cell_n = decoder_forward(x, h_0, c_0, packed, ncores=ncores)
    jax.block_until_ready((y, hidden_n, cell_n))

    assert y.shape == (B, 1, F)
    assert hidden_n.shape == (3, B, E)
    assert cell_n.shape == (3, B, E)

    # correctness vs. pure-JAX reference of the torch module
    y_ref, h_ref, c_ref = reference_forward(x, h_0, c_0, raw)
    np.testing.assert_allclose(np.asarray(y), np.asarray(y_ref), rtol=1e-4, atol=1e-4)
    np.testing.assert_allclose(np.asarray(hidden_n), np.asarray(h_ref), rtol=1e-4, atol=1e-4)
    np.testing.assert_allclose(np.asarray(cell_n), np.asarray(c_ref), rtol=1e-4, atol=1e-4)

    print("KERNEL_OK")
</pallas_src>

<mosaic_0001>
module attributes {stable_mosaic.version = 11 : i64} {
  func.func @decoder_kernel(%arg0: i32, %arg1: memref<8x8xf32, #tpu.memory_space<vmem>>, %arg2: memref<8x256xf32, #tpu.memory_space<vmem>>, %arg3: memref<3x64x128xf32, #tpu.memory_space<vmem>>, %arg4: memref<3x1x128xf32, #tpu.memory_space<vmem>>, %arg5: memref<32x128xf32, #tpu.memory_space<vmem>>, %arg6: memref<1x128xf32, #tpu.memory_space<vmem>>, %arg7: memref<128x128xf32, #tpu.memory_space<vmem>>, %arg8: memref<1x128xf32, #tpu.memory_space<vmem>>, %arg9: memref<8x128xf32, #tpu.memory_space<vmem>>, %arg10: memref<8x256xf32, #tpu.memory_space<vmem>>) attributes {dimension_semantics = [#tpu.dimension_semantics<parallel>], iteration_bounds = array<i64: 1>, scalar_prefetch = 0 : i64, scratch_operands = 0 : i64, tpu.core_type = #tpu.core_type<tc>, window_params = [{transform_indices = @transform_0, window_bounds = array<i64: 8, 8>}, {transform_indices = @transform_1, window_bounds = array<i64: 8, 256>}, {pipeline_mode = #tpu.pipeline_mode<synchronous>, transform_indices = @transform_2, window_bounds = array<i64: 3, 64, 128>}, {pipeline_mode = #tpu.pipeline_mode<synchronous>, transform_indices = @transform_3, window_bounds = array<i64: 3, 1, 128>}, {pipeline_mode = #tpu.pipeline_mode<synchronous>, transform_indices = @transform_4, window_bounds = array<i64: 32, 128>}, {pipeline_mode = #tpu.pipeline_mode<synchronous>, transform_indices = @transform_5, window_bounds = array<i64: 1, 128>}, {pipeline_mode = #tpu.pipeline_mode<synchronous>, transform_indices = @transform_6, window_bounds = array<i64: 128, 128>}, {pipeline_mode = #tpu.pipeline_mode<synchronous>, transform_indices = @transform_7, window_bounds = array<i64: 1, 128>}, {transform_indices = @transform_8, window_bounds = array<i64: 8, 128>}, {transform_indices = @transform_9, window_bounds = array<i64: 8, 256>}]} {
    %c0 = arith.constant 0 : index
    %c0_0 = arith.constant 0 : index
    %0 = vector.load %arg2[%c0, %c0_0] : memref<8x256xf32, #tpu.memory_space<vmem>>, vector<8x256xf32>
    %c0_1 = arith.constant 0 : index
    %c0_2 = arith.constant 0 : index
    %1 = vector.load %arg1[%c0_1, %c0_2] : memref<8x8xf32, #tpu.memory_space<vmem>>, vector<8x8xf32>
    %2 = vector.extract_strided_slice %0 {offsets = [0, 0], sizes = [8, 32], strides = [1, 1]} : vector<8x256xf32> to vector<8x32xf32>
    %cst = arith.constant 0.000000e+00 : f32
    %3 = vector.broadcast %cst : f32 to vector<8x24xf32>
    %4 = tpu.concatenate %1, %3, %2 in 1 : vector<8x8xf32>, vector<8x24xf32>, vector<8x32xf32> -> vector<8x64xf32>
    %5 = vector.extract_strided_slice %0 {offsets = [0, 96], sizes = [8, 32], strides = [1, 1]} : vector<8x256xf32> to vector<8x32xf32>
    %c0_3 = arith.constant 0 : index
    %c0_4 = arith.constant 0 : index
    %c0_5 = arith.constant 0 : index
    %6 = vector.load %arg3[%c0_3, %c0_4, %c0_5] : memref<3x64x128xf32, #tpu.memory_space<vmem>>, vector<1x64x128xf32>
    %7 = vector.shape_cast %6 : vector<1x64x128xf32> to vector<64x128xf32>
    %cst_6 = arith.constant dense<0.000000e+00> : vector<8x128xf32>
    %8 = tpu.matmul %4, %7, %cst_6 {dimension_numbers = #tpu.dot_dimension_numbers<[1], [0], [0], [1], [0, 0, 1, 1], [], []>} : vector<8x64xf32>, vector<64x128xf32>, vector<8x128xf32> -> vector<8x128xf32>
    %c0_7 = arith.constant 0 : index
    %c0_8 = arith.constant 0 : index
    %c0_9 = arith.constant 0 : index
    %9 = vector.load %arg4[%c0_7, %c0_8, %c0_9] : memref<3x1x128xf32, #tpu.memory_space<vmem>>, vector<1x1x128xf32>
    %10 = vector.shape_cast %9 : vector<1x1x128xf32> to vector<1x128xf32>
    %11 = vector.broadcast %10 : vector<1x128xf32> to vector<8x128xf32>
    %12 = arith.addf %8, %11 : vector<8x128xf32>
    %13 = arith.negf %12 : vector<8x128xf32>
    %14 = math.exp %13 : vector<8x128xf32>
    %cst_10 = arith.constant 1.000000e+00 : f32
    %15 = vector.broadcast %cst_10 : f32 to vector<8x128xf32>
    %16 = arith.addf %15, %14 : vector<8x128xf32>
    %17 = arith.divf %15, %16 : vector<8x128xf32>
    %18 = math.tanh %12 : vector<8x128xf32>
    %19 = vector.extract_strided_slice %17 {offsets = [0, 0], sizes = [8, 32], strides = [1, 1]} : vector<8x128xf32> to vector<8x32xf32>
    %20 = vector.extract_strided_slice %17 {offsets = [0, 32], sizes = [8, 32], strides = [1, 1]} : vector<8x128xf32> to vector<8x32xf32>
    %21 = vector.extract_strided_slice %18 {offsets = [0, 64], sizes = [8, 32], strides = [1, 1]} : vector<8x128xf32> to vector<8x32xf32>
    %22 = vector.extract_strided_slice %17 {offsets = [0, 96], sizes = [8, 32], strides = [1, 1]} : vector<8x128xf32> to vector<8x32xf32>
    %23 = arith.mulf %20, %5 : vector<8x32xf32>
    %24 = arith.mulf %19, %21 : vector<8x32xf32>
    %25 = arith.addf %23, %24 : vector<8x32xf32>
    %26 = math.tanh %25 : vector<8x32xf32>
    %27 = arith.mulf %22, %26 : vector<8x32xf32>
    %28 = vector.extract_strided_slice %0 {offsets = [0, 32], sizes = [8, 32], strides = [1, 1]} : vector<8x256xf32> to vector<8x32xf32>
    %29 = tpu.concatenate %27, %28 in 1 : vector<8x32xf32>, vector<8x32xf32> -> vector<8x64xf32>
    %30 = vector.extract_strided_slice %0 {offsets = [0, 128], sizes = [8, 32], strides = [1, 1]} : vector<8x256xf32> to vector<8x32xf32>
    %c1 = arith.constant 1 : index
    %c0_11 = arith.constant 0 : index
    %c0_12 = arith.constant 0 : index
    %31 = vector.load %arg3[%c1, %c0_11, %c0_12] : memref<3x64x128xf32, #tpu.memory_space<vmem>>, vector<1x64x128xf32>
    %32 = vector.shape_cast %31 : vector<1x64x128xf32> to vector<64x128xf32>
    %cst_13 = arith.constant dense<0.000000e+00> : vector<8x128xf32>
    %33 = tpu.matmul %29, %32, %cst_13 {dimension_numbers = #tpu.dot_dimension_numbers<[1], [0], [0], [1], [0, 0, 1, 1], [], []>} : vector<8x64xf32>, vector<64x128xf32>, vector<8x128xf32> -> vector<8x128xf32>
    %c1_14 = arith.constant 1 : index
    %c0_15 = arith.constant 0 : index
    %c0_16 = arith.constant 0 : index
    %34 = vector.load %arg4[%c1_14, %c0_15, %c0_16] : memref<3x1x128xf32, #tpu.memory_space<vmem>>, vector<1x1x128xf32>
    %35 = vector.shape_cast %34 : vector<1x1x128xf32> to vector<1x128xf32>
    %36 = vector.broadcast %35 : vector<1x128xf32> to vector<8x128xf32>
    %37 = arith.addf %33, %36 : vector<8x128xf32>
    %38 = arith.negf %37 : vector<8x128xf32>
    %39 = math.exp %38 : vector<8x128xf32>
    %cst_17 = arith.constant 1.000000e+00 : f32
    %40 = vector.broadcast %cst_17 : f32 to vector<8x128xf32>
    %41 = arith.addf %40, %39 : vector<8x128xf32>
    %42 = arith.divf %40, %41 : vector<8x128xf32>
    %43 = math.tanh %37 : vector<8x128xf32>
    %44 = vector.extract_strided_slice %42 {offsets = [0, 0], sizes = [8, 32], strides = [1, 1]} : vector<8x128xf32> to vector<8x32xf32>
    %45 = vector.extract_strided_slice %42 {offsets = [0, 32], sizes = [8, 32], strides = [1, 1]} : vector<8x128xf32> to vector<8x32xf32>
    %46 = vector.extract_strided_slice %43 {offsets = [0, 64], sizes = [8, 32], strides = [1, 1]} : vector<8x128xf32> to vector<8x32xf32>
    %47 = vector.extract_strided_slice %42 {offsets = [0, 96], sizes = [8, 32], strides = [1, 1]} : vector<8x128xf32> to vector<8x32xf32>
    %48 = arith.mulf %45, %30 : vector<8x32xf32>
    %49 = arith.mulf %44, %46 : vector<8x32xf32>
    %50 = arith.addf %48, %49 : vector<8x32xf32>
    %51 = math.tanh %50 : vector<8x32xf32>
    %52 = arith.mulf %47, %51 : vector<8x32xf32>
    %53 = vector.extract_strided_slice %0 {offsets = [0, 64], sizes = [8, 32], strides = [1, 1]} : vector<8x256xf32> to vector<8x32xf32>
    %54 = tpu.concatenate %52, %53 in 1 : vector<8x32xf32>, vector<8x32xf32> -> vector<8x64xf32>
    %55 = vector.extract_strided_slice %0 {offsets = [0, 160], sizes = [8, 32], strides = [1, 1]} : vector<8x256xf32> to vector<8x32xf32>
    %c2 = arith.constant 2 : index
    %c0_18 = arith.constant 0 : index
    %c0_19 = arith.constant 0 : index
    %56 = vector.load %arg3[%c2, %c0_18, %c0_19] : memref<3x64x128xf32, #tpu.memory_space<vmem>>, vector<1x64x128xf32>
    %57 = vector.shape_cast %56 : vector<1x64x128xf32> to vector<64x128xf32>
    %cst_20 = arith.constant dense<0.000000e+00> : vector<8x128xf32>
    %58 = tpu.matmul %54, %57, %cst_20 {dimension_numbers = #tpu.dot_dimension_numbers<[1], [0], [0], [1], [0, 0, 1, 1], [], []>} : vector<8x64xf32>, vector<64x128xf32>, vector<8x128xf32> -> vector<8x128xf32>
    %c2_21 = arith.constant 2 : index
    %c0_22 = arith.constant 0 : index
    %c0_23 = arith.constant 0 : index
    %59 = vector.load %arg4[%c2_21, %c0_22, %c0_23] : memref<3x1x128xf32, #tpu.memory_space<vmem>>, vector<1x1x128xf32>
    %60 = vector.shape_cast %59 : vector<1x1x128xf32> to vector<1x128xf32>
    %61 = vector.broadcast %60 : vector<1x128xf32> to vector<8x128xf32>
    %62 = arith.addf %58, %61 : vector<8x128xf32>
    %63 = arith.negf %62 : vector<8x128xf32>
    %64 = math.exp %63 : vector<8x128xf32>
    %cst_24 = arith.constant 1.000000e+00 : f32
    %65 = vector.broadcast %cst_24 : f32 to vector<8x128xf32>
    %66 = arith.addf %65, %64 : vector<8x128xf32>
    %67 = arith.divf %65, %66 : vector<8x128xf32>
    %68 = math.tanh %62 : vector<8x128xf32>
    %69 = vector.extract_strided_slice %67 {offsets = [0, 0], sizes = [8, 32], strides = [1, 1]} : vector<8x128xf32> to vector<8x32xf32>
    %70 = vector.extract_strided_slice %67 {offsets = [0, 32], sizes = [8, 32], strides = [1, 1]} : vector<8x128xf32> to vector<8x32xf32>
    %71 = vector.extract_strided_slice %68 {offsets = [0, 64], sizes = [8, 32], strides = [1, 1]} : vector<8x128xf32> to vector<8x32xf32>
    %72 = vector.extract_strided_slice %67 {offsets = [0, 96], sizes = [8, 32], strides = [1, 1]} : vector<8x128xf32> to vector<8x32xf32>
    %73 = arith.mulf %70, %55 : vector<8x32xf32>
    %74 = arith.mulf %69, %71 : vector<8x32xf32>
    %75 = arith.addf %73, %74 : vector<8x32xf32>
    %76 = math.tanh %75 : vector<8x32xf32>
    %77 = arith.mulf %72, %76 : vector<8x32xf32>
    %cst_25 = arith.constant 0.000000e+00 : f32
    %78 = vector.broadcast %cst_25 : f32 to vector<8x64xf32>
    %79 = tpu.concatenate %27, %52, %77, %25, %50, %75, %78 in 1 : vector<8x32xf32>, vector<8x32xf32>, vector<8x32xf32>, vector<8x32xf32>, vector<8x32xf32>, vector<8x32xf32>, vector<8x64xf32> -> vector<8x256xf32>
    %c0_26 = arith.constant 0 : index
    %c0_27 = arith.constant 0 : index
    %80 = vector.load %arg10[%c0_26, %c0_27] : memref<8x256xf32, #tpu.memory_space<vmem>>, vector<8x256xf32>
    tpu.vector_store %arg10[%c0_26, %c0_27], %79 {strides = array<i32>} : memref<8x256xf32, #tpu.memory_space<vmem>>, vector<8x256xf32>,
    %c0_28 = arith.constant 0 : index
    %c0_29 = arith.constant 0 : index
    %81 = vector.load %arg5[%c0_28, %c0_29] : memref<32x128xf32, #tpu.memory_space<vmem>>, vector<32x128xf32>
    %cst_30 = arith.constant dense<0.000000e+00> : vector<8x128xf32>
    %82 = tpu.matmul %77, %81, %cst_30 {dimension_numbers = #tpu.dot_dimension_numbers<[1], [0], [0], [1], [0, 0, 1, 1], [], []>} : vector<8x32xf32>, vector<32x128xf32>, vector<8x128xf32> -> vector<8x128xf32>
    %c0_31 = arith.constant 0 : index
    %c0_32 = arith.constant 0 : index
    %83 = vector.load %arg6[%c0_31, %c0_32] : memref<1x128xf32, #tpu.memory_space<vmem>>, vector<1x128xf32>
    %84 = vector.broadcast %83 : vector<1x128xf32> to vector<8x128xf32>
    %85 = arith.addf %82, %84 : vector<8x128xf32>
    %cst_33 = arith.constant 0.000000e+00 : f32
    %86 = vector.broadcast %cst_33 : f32 to vector<8x128xf32>
    %87 = arith.maximumf %85, %86 : vector<8x128xf32>
    %c0_34 = arith.constant 0 : index
    %c0_35 = arith.constant 0 : index
    %88 = vector.load %arg7[%c0_34, %c0_35] : memref<128x128xf32, #tpu.memory_space<vmem>>, vector<128x128xf32>
    %cst_36 = arith.constant dense<0.000000e+00> : vector<8x128xf32>
    %89 = tpu.matmul %87, %88, %cst_36 {dimension_numbers = #tpu.dot_dimension_numbers<[1], [0], [0], [1], [0, 0, 1, 1], [], []>} : vector<8x128xf32>, vector<128x128xf32>, vector<8x128xf32> -> vector<8x128xf32>
    %c0_37 = arith.constant 0 : index
    %c0_38 = arith.constant 0 : index
    %90 = vector.load %arg8[%c0_37, %c0_38] : memref<1x128xf32, #tpu.memory_space<vmem>>, vector<1x128xf32>
    %91 = vector.broadcast %90 : vector<1x128xf32> to vector<8x128xf32>
    %92 = arith.addf %89, %91 : vector<8x128xf32>
    %c0_39 = arith.constant 0 : index
    %c0_40 = arith.constant 0 : index
    %93 = vector.load %arg9[%c0_39, %c0_40] : memref<8x128xf32, #tpu.memory_space<vmem>>, vector<8x128xf32>
    tpu.vector_store %arg9[%c0_39, %c0_40], %92 {strides = array<i32>} : memref<8x128xf32, #tpu.memory_space<vmem>>, vector<8x128xf32>,
    return
  }
  func.func @transform_0(%arg0: i32) -> (i32, i32) {
    %c0_i32 = arith.constant 0 : i32
    %c0_i32_0 = arith.constant 0 : i32
    return %arg0, %c0_i32 : i32, i32
  }
  func.func @transform_1(%arg0: i32) -> (i32, i32) {
    %c0_i32 = arith.constant 0 : i32
    %c0_i32_0 = arith.constant 0 : i32
    return %arg0, %c0_i32 : i32, i32
  }
  func.func @transform_2(%arg0: i32) -> (i32, i32, i32) {
    %c0_i32 = arith.constant 0 : i32
    %c0_i32_0 = arith.constant 0 : i32
    %c0_i32_1 = arith.constant 0 : i32
    %c0_i32_2 = arith.constant 0 : i32
    return %c0_i32, %c0_i32_0, %c0_i32_1 : i32, i32, i32
  }
  func.func @transform_3(%arg0: i32) -> (i32, i32, i32) {
    %c0_i32 = arith.constant 0 : i32
    %c0_i32_0 = arith.constant 0 : i32
    %c0_i32_1 = arith.constant 0 : i32
    %c0_i32_2 = arith.constant 0 : i32
    return %c0_i32, %c0_i32_0, %c0_i32_1 : i32, i32, i32
  }
  func.func @transform_4(%arg0: i32) -> (i32, i32) {
    %c0_i32 = arith.constant 0 : i32
    %c0_i32_0 = arith.constant 0 : i32
    %c0_i32_1 = arith.constant 0 : i32
    return %c0_i32, %c0_i32_0 : i32, i32
  }
  func.func @transform_5(%arg0: i32) -> (i32, i32) {
    %c0_i32 = arith.constant 0 : i32
    %c0_i32_0 = arith.constant 0 : i32
    %c0_i32_1 = arith.constant 0 : i32
    return %c0_i32, %c0_i32_0 : i32, i32
  }
  func.func @transform_6(%arg0: i32) -> (i32, i32) {
    %c0_i32 = arith.constant 0 : i32
    %c0_i32_0 = arith.constant 0 : i32
    %c0_i32_1 = arith.constant 0 : i32
    return %c0_i32, %c0_i32_0 : i32, i32
  }
  func.func @transform_7(%arg0: i32) -> (i32, i32) {
    %c0_i32 = arith.constant 0 : i32
    %c0_i32_0 = arith.constant 0 : i32
    %c0_i32_1 = arith.constant 0 : i32
    return %c0_i32, %c0_i32_0 : i32, i32
  }
  func.func @transform_8(%arg0: i32) -> (i32, i32) {
    %c0_i32 = arith.constant 0 : i32
    %c0_i32_0 = arith.constant 0 : i32
    return %arg0, %c0_i32 : i32, i32
  }
  func.func @transform_9(%arg0: i32) -> (i32, i32) {
    %c0_i32 = arith.constant 0 : i32
    %c0_i32_0 = arith.constant 0 : i32
    return %arg0, %c0_i32 : i32, i32
  }
}

</mosaic_0001>

<bundles_post_ra>
// kernel: decoder_forward.1
= control target key start
LH: loop header
LB: loop body
LE: loop exit
PB: predicated region body
PF: predicated region fallthrough
CT: control target
= control target key end

     0   :  { %15 = vsyncpa [#allocation3], 0  ;;  %s1185_s0 = inlined_call_operand.vmem [shape: f32[8,8], index: 0, kind: input, shape index: {}]   ;;  %s1186_s1 = inlined_call_operand.vmem [shape: f32[8,256], index: 1, kind: input, shape index: {}, may-alias: {1,9}]   ;;  %s1187_s2 = inlined_call_operand.vmem [shape: f32[3,64,128], index: 2, kind: input, shape index: {}]   ;;  %s1188_s3 = inlined_call_operand.vmem [shape: f32[3,1,128], index: 3, kind: input, shape index: {}]   ;;  %s1189_s4 = inlined_call_operand.vmem [shape: f32[32,128], index: 4, kind: input, shape index: {}]   ;;  %s1190_s5 = inlined_call_operand.vmem [shape: f32[1,128], index: 5, kind: input, shape index: {}]   ;;  %s1191_s6 = inlined_call_operand.hbm [shape: f32[128,128], index: 6, kind: input, shape index: {}]   ;;  %s1192_s7 = inlined_call_operand.vmem [shape: f32[1,128], index: 7, kind: input, shape index: {}]   ;;  %s1193_s8 = inlined_call_operand.hbm [shape: f32[8,128], index: 8, kind: output, shape index: {0}]   ;;  %s1194_s9 = inlined_call_operand.vmem [shape: f32[8,256], index: 9, kind: output, shape index: {1}, may-alias: {1,9}]  }
   0x1   :  { %16 = vsyncpa [#allocation4], 0  ;;  %s899_s30 = smov [#allocation2]  }
   0x2   :  { %s34_s10 = sshll.u32 %s899_s30, 4  ;;  %s35_s10 = int_to_ptr.vmem [resolvable:$true] %s34_s10 }
   0x3   :  { %s863_s11 = scalar_lea.vmem %s35_s10, 2048  ;;  %p868_p1 = scmp.lt.s32.totalorder %s35_s10, %s35_s10 }
   0x4   :  { %p864_p0 = scmp.ne.s32.totalorder %s35_s10, %s863_s11  ;;  %p869_p2 = scmp.lt.s32.totalorder %s863_s11, %s863_s11 }
   0x6   :  { %p870_p3 = por %p869_p2, %p868_p1 }
   0x8   :  { %p871_p4 = pnand %p870_p3, %p864_p0 }
   0xa   :  { %874 = shalt.err (!%p871_p4)
}
   0xb   :  { %s900_s12 = smov 128   ;;  %s901_s13 = smov 8  }
   0xc   :  { %40 = dma.hbm_to_vmem [thread:$0]  %s1191_s6, 2048, %s35_s10, [#allocation3], %s900_s12, %s900_s12, %s901_s13  }
   0xd   :  { %895 = dma.done.wait [#allocation3], 2048  }
   0xe   :  { %896 = vsyncadd [#allocation3], 4294965248  ;;  %v902_v0 = vmov 0.0   ;;  %vm903_vm0 = vmmov 0   ;;  %v970_v1 = vld [vmem:[%s1186_s1] sm:$0xff]  ;;  %v64_v2 = vld [vmem:[%s1187_s2 + $0x38] sm:$0xff] }
   0xf   :  { %719 = vmatprep.subr.mxu0 %v902_v0  ;;  %776 = vmatprep.subr.mxu1 %v902_v0  ;;  %v63_v3 = vld [vmem:[%s1187_s2 + $0x30] sm:$0xff]  ;;  %s904_s21 = smov 32   ;;  %v62_v4 = vld [vmem:[%s1187_s2 + $0x28] sm:$0xff]  ;;  %s905_s24 = smov 64   ;;  %v61_v5 = vld [vmem:[%s1187_s2 + $0x20] sm:$0xff]  ;;  %vm53_vm1 = vcmask 64512  }
  0x10   :  { %735 = vmatprep.mubr.msk.f32.mxu0 %vm903_vm0, %v902_v0  ;;  %784 = vmatprep.mubr.msk.f32.mxu1 %vm903_vm0, %v902_v0  ;;  %v60_v6 = vld [vmem:[%s1187_s2 + $0x18] sm:$0xff]  ;;  %v59_v7 = vld [vmem:[%s1187_s2 + $0x10] sm:$0xff]  ;;  %v58_v8 = vld [vmem:[%s1187_s2 + $0x8] sm:$0xff]  ;;  %vm55_vm2 = vcmask 261120   ;;  %vm72_vm3 = vcmask 523264   ;;  %s906_s30 = smov 96  }
  0x11   :  { %50 = vrot.lane.b32.xlu0 %v970_v1, %s904_s21  ;;  %720 = vmatpush3.msra.mxu0 %v64_v2  ;;  %v57_v9 = vld [vmem:[%s1187_s2] sm:$0xff]  ;;  %v650_v29 = vld [vmem:[%s1187_s2 + $0x78] sm:$0xff]  ;;  %v649_v30 = vld [vmem:[%s1187_s2 + $0x70] sm:$0xff]  ;;  %vm435_vm4 = vcmask 785408   ;;  %s907_s22 = smov [#allocation5]  }
  0x12   :  { %721 = vmatprep.subr.mxu0 %v902_v0  ;;  %153 = vrot.lane.b32.xlu1 %v970_v1, %s905_s24  ;;  %v48_v10 = vld [vmem:[%s1185_s0] sm:$0xff]  ;;  %v648_v31 = vld [vmem:[%s1187_s2 + $0x68] sm:$0xff]  ;;  %v646_v33 = vld [vmem:[%s1187_s2 + $0x58] sm:$0xff]  ;;  %s627_s23 = sshll.u32 %s907_s22, 4  ;;  %s628_s23 = int_to_ptr.vmem [resolvable:$true] %s627_s23 }
  0x13   :  { %722 = vmatpush3.msra.mxu0 %v63_v3  ;;  %v54_v11 = vsel %vm53_vm1, %v48_v10, 0.0  ;;  %v640_v14 = vld [vmem:[%s1188_s3] ss:$0 sm:$0xff]  ;;  %v645_v34 = vld [vmem:[%s1187_s2 + $0x50] sm:$0xff]  ;;  %v644_v36 = vld [vmem:[%s1187_s2 + $0x48] sm:$0xff]  ;;  %s875_s25 = scalar_lea.vmem %s628_s23, 128  ;;  %p880_p6 = scmp.lt.s32.totalorder %s628_s23, %s628_s23 }
  0x14   :  { %723 = vmatprep.subr.mxu0 %v902_v0  ;;  %v647_v32 = vld [vmem:[%s1187_s2 + $0x60] sm:$0xff]  ;;  %v1060_v40 = vld [vmem:[%s1186_s1 + $0x8] sm:$0xff]  ;;  %v662_v58 = vld [vmem:[%s1187_s2 + $0xb8] sm:$0xff]  ;;  %p876_p5 = scmp.ne.s32.totalorder %s628_s23, %s875_s25  ;;  %p881_p7 = scmp.lt.s32.totalorder %s875_s25, %s875_s25 }
  0x15   :  { %724 = vmatpush3.msra.mxu0 %v62_v4  ;;  %v643_v37 = vld [vmem:[%s1187_s2 + $0x40] sm:$0xff]  ;;  %v661_v59 = vld [vmem:[%s1187_s2 + $0xb0] sm:$0xff]  ;;  %v660_v60 = vld [vmem:[%s1187_s2 + $0xa8] sm:$0xff] }
  0x16   :  { %725 = vmatprep.subr.mxu0 %v902_v0  ;;  %v652_v43 = vld [vmem:[%s1188_s3 + $0x1] ss:$0 sm:$0xff]  ;;  %v658_v62 = vld [vmem:[%s1187_s2 + $0x98] sm:$0xff]  ;;  %v657_v63 = vld [vmem:[%s1187_s2 + $0x90] sm:$0xff]  ;;  %p882_p8 = por %p881_p7, %p880_p6 }
  0x17   :  { %726 = vmatpush3.msra.mxu0 %v61_v5  ;;  %v659_v61 = vld [vmem:[%s1187_s2 + $0xa0] sm:$0xff]  ;;  %v656_v3 = vld [vmem:[%s1187_s2 + $0x88] sm:$0xff] }
  0x18   :  { %727 = vmatprep.subr.mxu0 %v902_v0  ;;  %v655_v4 = vld [vmem:[%s1187_s2 + $0x80] sm:$0xff]  ;;  %p883_p9 = pnand %p882_p8, %p876_p5 }
  0x19   :  { %728 = vmatpush3.msra.mxu0 %v60_v6  ;;  %v664_v10 = vld [vmem:[%s1188_s3 + $0x2] ss:$0 sm:$0xff] }
  0x1a   :  { %729 = vmatprep.subr.mxu0 %v902_v0 }
  0x1b   :  { %730 = vmatpush3.msra.mxu0 %v59_v7 }
  0x1c   :  { %731 = vmatprep.subr.mxu0 %v902_v0 }
  0x1d   :  { %732 = vmatpush3.msra.mxu0 %v58_v8 }
  0x1e   :  { %733 = vmatprep.subr.mxu0 %v902_v0 }
  0x1f   :  { %734 = vmatpush3.msra.mxu0 %v57_v9 }
  0x20   :  { %738 = vmatprep.subr.mxu0 %v902_v0 }
  0x83   :  { %v51_v12 = vpop.permute.xlu0 %50 }
  0x84   :  { %v56_v13 = vsel %vm55_vm2, %v54_v11, %v51_v12  ;;  %v154_v25 = vpop.permute.xlu1 %153 }
  0x85   :  { %736 = vmatmul.mubr.msk.f32.vlgmr.msra.gmra.mxu0 %vm72_vm3, %v56_v13 }
  0x86   :  { %754 = vmatprep.mubr.msk.f32.mxu0 %vm903_vm0, %v902_v0  ;;  %739 = vmatpush3.msra.mxu0 %v650_v29 }
  0x87   :  { %740 = vmatprep.subr.mxu0 %v902_v0 }
  0x88   :  { %741 = vmatpush3.msra.mxu0 %v649_v30 }
  0x89   :  { %742 = vmatprep.subr.mxu0 %v902_v0 }
  0x8a   :  { %743 = vmatpush3.msra.mxu0 %v648_v31 }
  0x8b   :  { %744 = vmatprep.subr.mxu0 %v902_v0 }
  0x8c   :  { %745 = vmatpush3.msra.mxu0 %v647_v32 }
  0x8d   :  { %746 = vmatprep.subr.mxu0 %v902_v0 }
  0x8e   :  { %747 = vmatpush3.msra.mxu0 %v646_v33 }
  0x8f   :  { %748 = vmatprep.subr.mxu0 %v902_v0 }
  0x90   :  { %749 = vmatpush3.msra.mxu0 %v645_v34 }
  0x91   :  { %750 = vmatprep.subr.mxu0 %v902_v0 }
  0x92   :  { %751 = vmatpush3.msra.mxu0 %v644_v36 }
  0x93   :  { %752 = vmatprep.subr.mxu0 %v902_v0 }
  0x94   :  { %753 = vmatpush3.msra.mxu0 %v643_v37  ;;  %v541_v37 = vld [vmem:[#allocation2 + $0x70] sm:$0xff] }
  0x95   :  { %757 = vmatprep.subr.mxu0 %v902_v0 }
 0x145   :  { %v142_v15 = vpop.f32.mrf.mxu0 }
 0x146   :  { %v143_v16 = vadd.f32 %v640_v14, %v142_v15 }
 0x147   :  { %v737_v17 = vpop.f32.mrf.mxu0 }
 0x148   :  { %831 = vtanh.f32 %v143_v16  ;;  %v642_v19 = vmul.f32 -1.442695, %v143_v16 }
 0x14a   :  { %833 = vpow2.f32 %v642_v19 }
 0x155   :  { %v832_v18 = vpop.eup %831 }
 0x156   :  { %158 = vrot.lane.b32.xlu0 %v832_v18, %s905_s24 }
 0x157   :  { %v834_v20 = vpop.eup %833 }
 0x158   :  { %v149_v21 = vadd.f32 1.0, %v834_v20 }
 0x15a   :  { %835 = vrcp.f32 %v149_v21 }
 0x167   :  { %v836_v22 = vpop.eup %835 }
 0x168   :  { %v156_v26 = vmul.f32 %v836_v22, %v154_v25 }
 0x1c8   :  { %v159_v23 = vpop.permute.xlu0 %158 }
 0x1c9   :  { %v161_v24 = vmul.f32 %v836_v22, %v159_v23  ;;  %v444_v23 = vld [vmem:[%s1189_s4 + $0x18] sm:$0xff] }
 0x1ca   :  { %777 = vmatpush3.msra.mxu1 %v444_v23 }
 0x1cb   :  { %163 = vrot.lane.b32.xlu1 %v161_v24, %s904_s21  ;;  %v443_v24 = vld [vmem:[%s1189_s4 + $0x10] sm:$0xff]  ;;  %778 = vmatprep.subr.mxu1 %v902_v0 }
 0x1cc   :  { %779 = vmatpush3.msra.mxu1 %v443_v24 }
 0x1cd   :  { %780 = vmatprep.subr.mxu1 %v902_v0 }
 0x23d   :  { %v164_v27 = vpop.permute.xlu1 %163 }
 0x23e   :  { %v1020_v28 = vadd.f32 %v164_v27, %v156_v26  ;;  %v442_v26 = vld [vmem:[%s1189_s4 + $0x8] sm:$0xff]  ;;  %v441_v27 = vld [vmem:[%s1189_s4] sm:$0xff] }
 0x23f   :  { %781 = vmatpush3.msra.mxu1 %v442_v26 }
 0x240   :  { %837 = vtanh.f32 %v1020_v28  ;;  %782 = vmatprep.subr.mxu1 %v902_v0 }
 0x241   :  { %783 = vmatpush3.msra.mxu1 %v441_v27 }
 0x242   :  { %787 = vmatprep.subr.mxu1 %v902_v0 }
 0x24d   :  { %v838_v35 = vpop.eup %837 }
 0x24e   :  { %169 = vrot.lane.b32.xlu0 %v838_v35, %s905_s24  ;;  %v542_v35 = vld [vmem:[#allocation2 + $0x78] sm:$0xff] }
 0x2c0   :  { %v170_v38 = vpop.permute.xlu0 %169 }
 0x2c1   :  { %v172_v39 = vmul.f32 %v836_v22, %v170_v38  ;;  %v540_v38 = vld [vmem:[#allocation2 + $0x68] sm:$0xff] }
 0x2c3   :  { %174 = vrot.lane.b32.xlu1 %v172_v39, %s904_s21 }
 0x2c7   :  { %276 = vrot.lane.b32.xlu1 %v1060_v40, %s904_s21 }
 0x335   :  { %v1064_v41 = vpop.permute.xlu1 %174 }
 0x336   :  { %v177_v42 = vsel %vm55_vm2, %v1064_v41, %v970_v1 }
 0x337   :  { %755 = vmatmul.mubr.msk.f32.vlgmr.msra.gmra.mxu0 %vm72_vm3, %v177_v42  ;;  %v538_v42 = vld [vmem:[#allocation2 + $0x58] sm:$0xff] }
 0x338   :  { %773 = vmatprep.mubr.msk.f32.mxu0 %vm903_vm0, %v902_v0  ;;  %758 = vmatpush3.msra.mxu0 %v662_v58 }
 0x339   :  { %v277_v54 = vpop.permute.xlu1 %276  ;;  %759 = vmatprep.subr.mxu0 %v902_v0 }
 0x33a   :  { %760 = vmatpush3.msra.mxu0 %v661_v59 }
 0x33b   :  { %761 = vmatprep.subr.mxu0 %v902_v0 }
 0x33c   :  { %762 = vmatpush3.msra.mxu0 %v660_v60 }
 0x33d   :  { %763 = vmatprep.subr.mxu0 %v902_v0 }
 0x33e   :  { %764 = vmatpush3.msra.mxu0 %v659_v61  ;;  %v669_v61 = vld [vmem:[%s1192_s7] ss:$0 sm:$0xff] }
 0x33f   :  { %765 = vmatprep.subr.mxu0 %v902_v0 }
 0x340   :  { %766 = vmatpush3.msra.mxu0 %v658_v62 }
 0x341   :  { %767 = vmatprep.subr.mxu0 %v902_v0 }
 0x342   :  { %768 = vmatpush3.msra.mxu0 %v657_v63 }
 0x343   :  { %769 = vmatprep.subr.mxu0 %v902_v0 }
 0x344   :  { %770 = vmatpush3.msra.mxu0 %v656_v3 }
 0x345   :  { %771 = vmatprep.subr.mxu0 %v902_v0 }
 0x346   :  { %772 = vmatpush3.msra.mxu0 %v655_v4 }
 0x3f7   :  { %v264_v44 = vpop.f32.mrf.mxu0 }
 0x3f8   :  { %v265_v45 = vadd.f32 %v652_v43, %v264_v44 }
 0x3f9   :  { %v756_v46 = vpop.f32.mrf.mxu0 }
 0x3fa   :  { %839 = vtanh.f32 %v265_v45  ;;  %v654_v48 = vmul.f32 -1.442695, %v265_v45  ;;  %v537_v46 = vld [vmem:[#allocation2 + $0x50] sm:$0xff] }
 0x3fc   :  { %841 = vpow2.f32 %v654_v48  ;;  %v534_v48 = vld [vmem:[#allocation2 + $0x38] sm:$0xff] }
 0x407   :  { %v840_v47 = vpop.eup %839 }
 0x408   :  { %281 = vrot.lane.b32.xlu0 %v840_v47, %s905_s24  ;;  %v536_v47 = vld [vmem:[#allocation2 + $0x48] sm:$0xff] }
 0x409   :  { %v842_v49 = vpop.eup %841 }
 0x40a   :  { %v271_v50 = vadd.f32 1.0, %v842_v49  ;;  %v533_v49 = vld [vmem:[#allocation2 + $0x30] sm:$0xff] }
 0x40c   :  { %843 = vrcp.f32 %v271_v50  ;;  %v532_v50 = vld [vmem:[#allocation2 + $0x28] sm:$0xff] }
 0x419   :  { %v844_v51 = vpop.eup %843 }
 0x41a   :  { %v279_v55 = vmul.f32 %v844_v51, %v277_v54  ;;  %v528_v54 = vld [vmem:[#allocation2 + $0x8] sm:$0xff] }
 0x47a   :  { %v282_v52 = vpop.permute.xlu0 %281 }
 0x47b   :  { %v284_v53 = vmul.f32 %v844_v51, %v282_v52  ;;  %v530_v52 = vld [vmem:[#allocation2 + $0x18] sm:$0xff] }
 0x47d   :  { %286 = vrot.lane.b32.xlu0 %v284_v53, %s904_s21  ;;  %v529_v53 = vld [vmem:[#allocation2 + $0x10] sm:$0xff] }
 0x4ef   :  { %v287_v56 = vpop.permute.xlu0 %286 }
 0x4f0   :  { %v1077_v57 = vadd.f32 %v287_v56, %v279_v55  ;;  %v527_v55 = vld [vmem:[#allocation2] sm:$0xff] }
 0x4f1   :  { %v667_v56 = vld [vmem:[%s1190_s5] ss:$0 sm:$0xff] }
 0x4f2   :  { %845 = vtanh.f32 %v1077_v57 }
 0x4ff   :  { %v846_v2 = vpop.eup %845 }
 0x500   :  { %292 = vrot.lane.b32.xlu1 %v846_v2, %s905_s24 }
 0x504   :  { %300 = vrot.lane.b32.xlu1 %v970_v1, %s906_s30 }
 0x572   :  { %v293_v5 = vpop.permute.xlu1 %292 }
 0x573   :  { %v295_v6 = vmul.f32 %v844_v51, %v293_v5  ;;  %v531_v51 = vld [vmem:[#allocation2 + $0x20] sm:$0xff] }
 0x575   :  { %297 = vrot.lane.b32.xlu0 %v295_v6, %s904_s21 }
 0x576   :  { %v301_v7 = vpop.permute.xlu1 %300 }
 0x5e7   :  { %v298_v8 = vpop.permute.xlu0 %297 }
 0x5e8   :  { %v303_v9 = vsel %vm55_vm2, %v298_v8, %v301_v7 }
 0x5e9   :  { %774 = vmatmul.mubr.msk.f32.vlgmr.msra.gmra.mxu0 %vm72_vm3, %v303_v9 }
 0x6a9   :  { %v390_v1 = vpop.f32.mrf.mxu0 }
 0x6aa   :  { %v391_v11 = vadd.f32 %v664_v10, %v390_v1 }
 0x6ab   :  { %v775_v12 = vpop.f32.mrf.mxu0 }
 0x6ac   :  { %847 = vtanh.f32 %v391_v11  ;;  %v666_v14 = vmul.f32 -1.442695, %v391_v11 }
 0x6ae   :  { %849 = vpow2.f32 %v666_v14 }
 0x6b9   :  { %v848_v13 = vpop.eup %847 }
 0x6ba   :  { %403 = vrot.lane.b32.xlu0 %v848_v13, %s905_s24 }
 0x6bb   :  { %v850_v15 = vpop.eup %849 }
 0x6bc   :  { %v397_v16 = vadd.f32 1.0, %v850_v15 }
 0x6be   :  { %851 = vrcp.f32 %v397_v16 }
 0x6cb   :  { %v852_v17 = vpop.eup %851 }
 0x6cc   :  { %v401_v20 = vmul.f32 %v852_v17, %v1060_v40  ;;  %v539_v40 = vld [vmem:[#allocation2 + $0x60] sm:$0xff] }
 0x72c   :  { %v404_v18 = vpop.permute.xlu0 %403 }
 0x72d   :  { %v406_v19 = vmul.f32 %v852_v17, %v404_v18 }
 0x72f   :  { %408 = vrot.lane.b32.xlu1 %v406_v19, %s904_s21 }
 0x7a1   :  { %v409_v21 = vpop.permute.xlu1 %408 }
 0x7a2   :  { %v411_v22 = vadd.f32 %v409_v21, %v401_v20 }
 0x7a4   :  { %853 = vtanh.f32 %v411_v22 }
 0x7b1   :  { %v854_v25 = vpop.eup %853 }
 0x7b2   :  { %414 = vrot.lane.b32.xlu0 %v854_v25, %s905_s24 }
 0x7b6   :  { %418 = vrot.lane.b32.xlu0 %v295_v6, %s905_s24 }
 0x7ba   :  { %430 = vrot.lane.b32.xlu0 %v1077_v57, %s906_s30 }
 0x824   :  { %v415_v29 = vpop.permute.xlu0 %414 }
 0x825   :  { %v417_v30 = vmul.f32 %v852_v17, %v415_v29 }
 0x827   :  { %452 = vrot.lane.b32.xlu1 %v417_v30, %s904_s21 }
 0x828   :  { %v419_v31 = vpop.permute.xlu0 %418 }
 0x82b   :  { %422 = vrot.lane.b32.xlu1 %v417_v30, %s906_s30 }
 0x82c   :  { %v431_v32 = vpop.permute.xlu0 %430 }
 0x82d   :  { %v437_v33 = vsel %vm55_vm2, %v431_v32, %v411_v22 }
 0x82e   :  { %v438_v34 = vsel %vm72_vm3, %v437_v33, 0.0 }
 0x82f   :  { %440 = vst [vmem:[%s1194_s9 + $0x8] sm:$0xff] %v438_v34  ;;  %426 = vrot.lane.b32.xlu1 %v1020_v28, %s905_s24  ;;  %v433_v28 = vsel %vm55_vm2, %v1064_v41, %v419_v31  ;;  %v535_v41 = vld [vmem:[#allocation2 + $0x40] sm:$0xff] }
 0x899   :  { %v453_v36 = vpop.permute.xlu1 %452 }
 0x89a   :  { %785 = vmatmul.mubr.msk.f32.vlgmr.msra.gmra.mxu1 %vm55_vm2, %v453_v36 }
 0x89b   :  { %788 = vmatpush3.msra.mxu1 %v542_v35  ;;  %819 = vmatprep.mubr.msk.f32.mxu1 %vm903_vm0, %v902_v0 }
 0x89c   :  { %789 = vmatprep.subr.mxu1 %v902_v0 }
 0x89d   :  { %v423_v39 = vpop.permute.xlu1 %422  ;;  %790 = vmatpush3.msra.mxu1 %v541_v37 }
 0x89e   :  { %791 = vmatprep.subr.mxu1 %v902_v0  ;;  %v434_v43 = vsel %vm72_vm3, %v433_v28, %v423_v39 }
 0x89f   :  { %792 = vmatpush3.msra.mxu1 %v540_v38 }
 0x8a0   :  { %793 = vmatprep.subr.mxu1 %v902_v0 }
 0x8a1   :  { %v427_v44 = vpop.permute.xlu1 %426  ;;  %794 = vmatpush3.msra.mxu1 %v539_v40 }
 0x8a2   :  { %v436_v45 = vsel %vm435_vm4, %v434_v43, %v427_v44  ;;  %795 = vmatprep.subr.mxu1 %v902_v0 }
 0x8a3   :  { %439 = vst [vmem:[%s1194_s9] sm:$0xff] %v436_v45  ;;  %796 = vmatpush3.msra.mxu1 %v538_v42 }
 0x8a4   :  { %797 = vmatprep.subr.mxu1 %v902_v0 }
 0x8a5   :  { %798 = vmatpush3.msra.mxu1 %v537_v46 }
 0x8a6   :  { %799 = vmatprep.subr.mxu1 %v902_v0 }
 0x8a7   :  { %800 = vmatpush3.msra.mxu1 %v536_v47 }
 0x8a8   :  { %801 = vmatprep.subr.mxu1 %v902_v0 }
 0x8a9   :  { %802 = vmatpush3.msra.mxu1 %v535_v41 }
 0x8aa   :  { %803 = vmatprep.subr.mxu1 %v902_v0 }
 0x8ab   :  { %804 = vmatpush3.msra.mxu1 %v534_v48 }
 0x8ac   :  { %805 = vmatprep.subr.mxu1 %v902_v0 }
 0x8ad   :  { %806 = vmatpush3.msra.mxu1 %v533_v49 }
 0x8ae   :  { %807 = vmatprep.subr.mxu1 %v902_v0 }
 0x8af   :  { %808 = vmatpush3.msra.mxu1 %v532_v50 }
 0x8b0   :  { %809 = vmatprep.subr.mxu1 %v902_v0 }
 0x8b1   :  { %810 = vmatpush3.msra.mxu1 %v531_v51 }
 0x8b2   :  { %811 = vmatprep.subr.mxu1 %v902_v0 }
 0x8b3   :  { %812 = vmatpush3.msra.mxu1 %v530_v52 }
 0x8b4   :  { %813 = vmatprep.subr.mxu1 %v902_v0 }
 0x8b5   :  { %814 = vmatpush3.msra.mxu1 %v529_v53 }
 0x8b6   :  { %815 = vmatprep.subr.mxu1 %v902_v0 }
 0x8b7   :  { %816 = vmatpush3.msra.mxu1 %v528_v54 }
 0x8b8   :  { %817 = vmatprep.subr.mxu1 %v902_v0 }
 0x8b9   :  { %818 = vmatpush3.msra.mxu1 %v527_v55 }
 0x95a   :  { %v522_v57 = vpop.f32.mrf.mxu1 }
 0x95b   :  { %v523_v58 = vadd.f32 %v667_v56, %v522_v57 }
 0x95c   :  { %v786_v59 = vpop.f32.mrf.mxu1 }
 0x95d   :  { %v526_v60 = vmax.f32 %v523_v58, 0.0 }
 0x95f   :  { %820 = vmatmul.mubr.f32.vlgmr.msra.gmra.mxu1 %v526_v60 }
 0xa1f   :  { %v616_v62 = vpop.f32.mrf.mxu1 }
 0xa20   :  { %v617_v63 = vadd.f32 %v669_v61, %v616_v62 }
 0xa21   :  { %v821_v0 = vpop.f32.mrf.mxu1 }
 0xa22   :  { %620 = vst [vmem:[#allocation5] sm:$0xff] %v617_v63 }
 0xa23   :  { %886 = shalt.err (!%p883_p9)
}
 0xa24   :  { %630 = dma.vmem_to_hbm [thread:$0]  %s628_s23, 128, %s1193_s8, [#allocation4]  }
 0xa25   :  { %897 = dma.done.wait [#allocation4], 128  }
 0xa26   :  { %898 = vsyncadd [#allocation4], 4294967168 }
 0xa27   :  { %638 = vsyncpa [#allocation3], 1 }
 0xa28   :  { %639 = vsyncpa [#allocation4], 1 }

</bundles_post_ra>
